<compile_context>
chip_gen: v6e
topology: v6e:2x2x1
jax: 0.10.0
libtpu: 0.0.40
codegen_flags: <defaults>
</compile_context>

<pallas_src>
import math
from functools import partial

import jax
import jax.numpy as jnp
from jax.experimental import pallas as pl
from jax.experimental.pallas import tpu as pltpu


# ---------------------------------------------------------------------------
# helpers
# ---------------------------------------------------------------------------

def _tile(dim: int, preferred: int) -> int:
    """Pick `preferred` (a multiple of 8 and 128) if it divides `dim`, else the
    full dim (a full-extent block is always a legal block shape)."""
    if dim >= preferred and dim % preferred == 0:
        return preferred
    return dim


def _compiler_params(semantics):
    return pltpu.CompilerParams(
        dimension_semantics=semantics,
        vmem_limit_bytes=48 * 1024 * 1024,  # safe on v5e/v6e (128 MiB) and v7x (64 MiB)
    )


# ---------------------------------------------------------------------------
# Linear (+ optional ReLU, + optional fused residual add)
# ---------------------------------------------------------------------------

def _linear_kernel(x_ref, w_ref, b_ref, o_ref, acc_ref, *, activation):
    @pl.when(pl.program_id(2) == 0)
    def _():
        acc_ref[...] = jnp.zeros_like(acc_ref)

    # Native-dtype MXU operands; f32 accumulation via preferred_element_type.
    acc_ref[...] += jnp.dot(x_ref[...], w_ref[...],
                            preferred_element_type=jnp.float32)

    @pl.when(pl.program_id(2) == pl.num_programs(2) - 1)
    def _():
        y = acc_ref[...] + b_ref[...].astype(jnp.float32)
        if activation == "relu":
            y = jnp.maximum(y, 0.0)
        o_ref[...] = y.astype(o_ref.dtype)


def _linear_residual_kernel(x_ref, w_ref, b_ref, r_ref, o_ref, acc_ref,
                            *, activation):
    @pl.when(pl.program_id(2) == 0)
    def _():
        acc_ref[...] = jnp.zeros_like(acc_ref)

    acc_ref[...] += jnp.dot(x_ref[...], w_ref[...],
                            preferred_element_type=jnp.float32)

    @pl.when(pl.program_id(2) == pl.num_programs(2) - 1)
    def _():
        y = acc_ref[...] + b_ref[...].astype(jnp.float32)
        if activation == "relu":
            y = jnp.maximum(y, 0.0)
        y = y + r_ref[...].astype(jnp.float32)
        o_ref[...] = y.astype(o_ref.dtype)


def linear(x2, w, b, *, activation=None, residual=None, tm=256, tn=512, tk=512):
    """y = activation(x2 @ w + b) (+ residual).  x2:(M,K)  w:(K,N)  b:(N,)."""
    M, K = x2.shape
    N = w.shape[1]
    tm, tn, tk = _tile(M, tm), _tile(N, tn), _tile(K, tk)
    grid = (M // tm, N // tn, K // tk)
    b2 = b.reshape(1, N)

    in_specs = [
        pl.BlockSpec((tm, tk), lambda i, j, k: (i, k)),
        pl.BlockSpec((tk, tn), lambda i, j, k: (k, j)),
        pl.BlockSpec((1, tn), lambda i, j, k: (0, j)),
    ]
    args = [x2, w, b2]
    if residual is not None:
        in_specs.append(pl.BlockSpec((tm, tn), lambda i, j, k: (i, j)))
        args.append(residual)
        kernel = partial(_linear_residual_kernel, activation=activation)
    else:
        kernel = partial(_linear_kernel, activation=activation)

    return pl.pallas_call(
        kernel,
        out_shape=jax.ShapeDtypeStruct((M, N), x2.dtype),
        grid_spec=pltpu.PrefetchScalarGridSpec(
            num_scalar_prefetch=0,
            grid=grid,
            in_specs=in_specs,
            out_specs=pl.BlockSpec((tm, tn), lambda i, j, k: (i, j)),
            scratch_shapes=[pltpu.VMEM((tm, tn), jnp.float32)],
        ),
        compiler_params=_compiler_params(("parallel", "parallel", "arbitrary")),
    )(*args)


# ---------------------------------------------------------------------------
# LayerNormalisation (scalar alpha/bias, unbiased std, divide by (std + eps))
# ---------------------------------------------------------------------------

def _layernorm_kernel(x_ref, alpha_ref, beta_ref, o_ref, *, eps):
    x = x_ref[...].astype(jnp.float32)
    d = x.shape[-1]
    mean = jnp.mean(x, axis=-1, keepdims=True)
    cent = x - mean
    # torch.std default is unbiased (ddof=1); reference divides by (std + eps).
    var = jnp.sum(cent * cent, axis=-1, keepdims=True) / jnp.float32(d - 1)
    std = jnp.sqrt(var)
    y = alpha_ref[...].astype(jnp.float32) * cent / (std + eps) \
        + beta_ref[...].astype(jnp.float32)
    o_ref[...] = y.astype(o_ref.dtype)


def layer_norm(x, alpha, beta, *, eps=1e-6, tm=256):
    shape = x.shape
    D = shape[-1]
    M = x.size // D
    x2 = x.reshape(M, D)
    tm = _tile(M, tm)
    out2 = pl.pallas_call(
        partial(_layernorm_kernel, eps=eps),
        out_shape=jax.ShapeDtypeStruct((M, D), x.dtype),
        grid_spec=pltpu.PrefetchScalarGridSpec(
            num_scalar_prefetch=0,
            grid=(M // tm,),
            in_specs=[
                pl.BlockSpec((tm, D), lambda i: (i, 0)),
                pl.BlockSpec((1, 1), lambda i: (0, 0)),
                pl.BlockSpec((1, 1), lambda i: (0, 0)),
            ],
            out_specs=pl.BlockSpec((tm, D), lambda i: (i, 0)),
        ),
        compiler_params=_compiler_params(("parallel",)),
    )(x2, alpha.reshape(1, 1), beta.reshape(1, 1))
    return out2.reshape(shape)


# ---------------------------------------------------------------------------
# Scaled dot-product attention (per batch, per head)
# ---------------------------------------------------------------------------

def _attention_kernel(q_ref, k_ref, v_ref, m_ref, o_ref, *, scale):
    q = q_ref[0, 0]          # (Sq, dk)
    k = k_ref[0, 0]          # (Sk, dk)
    v = v_ref[0, 0]          # (Sk, dk)
    mask = m_ref[0, 0]       # (Sq, Sk)

    # scores = (q @ k^T) * scale  (contract over dk, no explicit transpose)
    s = jax.lax.dot_general(q, k, (((1,), (1,)), ((), ())),
                            preferred_element_type=jnp.float32) * scale
    s = jnp.where(mask == 0, jnp.float32(-1e9), s)

    # numerically stable softmax over keys
    s_max = jnp.max(s, axis=-1, keepdims=True)
    p = jnp.exp(s - s_max)
    p = p / jnp.sum(p, axis=-1, keepdims=True)

    ctx = jnp.dot(p.astype(v.dtype), v, preferred_element_type=jnp.float32)
    o_ref[0, 0] = ctx.astype(o_ref.dtype)


def scaled_dot_attention(q, k, v, mask, *, scale):
    B, H, Sq, dk = q.shape
    Sk = k.shape[2]
    return pl.pallas_call(
        partial(_attention_kernel, scale=scale),
        out_shape=jax.ShapeDtypeStruct((B, H, Sq, dk), q.dtype),
        grid_spec=pltpu.PrefetchScalarGridSpec(
            num_scalar_prefetch=0,
            grid=(B, H),
            in_specs=[
                pl.BlockSpec((1, 1, Sq, dk), lambda b, h: (b, h, 0, 0)),
                pl.BlockSpec((1, 1, Sk, dk), lambda b, h: (b, h, 0, 0)),
                pl.BlockSpec((1, 1, Sk, dk), lambda b, h: (b, h, 0, 0)),
                pl.BlockSpec((1, 1, Sq, Sk), lambda b, h: (b, 0, 0, 0)),
            ],
            out_specs=pl.BlockSpec((1, 1, Sq, dk), lambda b, h: (b, h, 0, 0)),
        ),
        compiler_params=_compiler_params(("parallel", "parallel")),
    )(q, k, v, mask)


# ---------------------------------------------------------------------------
# Multi-head attention block and decoder block
# ---------------------------------------------------------------------------

def multi_head_attention(q_in, k_in, v_in, mask, p, *, h, residual):
    B, Sq, D = q_in.shape
    Sk = k_in.shape[1]
    dk = D // h

    q = linear(q_in.reshape(B * Sq, D), p["wq"], p["bq"])
    k = linear(k_in.reshape(B * Sk, D), p["wk"], p["bk"])
    v = linear(v_in.reshape(B * Sk, D), p["wv"], p["bv"])

    q = q.reshape(B, Sq, h, dk).transpose(0, 2, 1, 3)
    k = k.reshape(B, Sk, h, dk).transpose(0, 2, 1, 3)
    v = v.reshape(B, Sk, h, dk).transpose(0, 2, 1, 3)

    ctx = scaled_dot_attention(q, k, v, mask, scale=1.0 / math.sqrt(dk))
    ctx = ctx.transpose(0, 2, 1, 3).reshape(B * Sq, D)

    # Output projection with the residual add fused into the kernel epilogue.
    out = linear(ctx, p["wo"], p["bo"], residual=residual.reshape(B * Sq, D))
    return out.reshape(B, Sq, D)


def decoder_block(x, encoder_output, src_mask, tgt_mask, params, *, h, eps=1e-6):
    ln = params["ln"]

    # Sublayer 1: masked self-attention (pre-norm residual).
    h1 = layer_norm(x, ln[0]["alpha"], ln[0]["bias"], eps=eps)
    x = multi_head_attention(h1, h1, h1, tgt_mask, params["self_attn"],
                             h=h, residual=x)

    # Sublayer 2: cross-attention.  NOTE: the reference forward literally
    # reuses self_attention_block here (cross_attention_block is never called);
    # we mirror that, so params["cross_attn"] exists but stays unused.
    h2 = layer_norm(x, ln[1]["alpha"], ln[1]["bias"], eps=eps)
    x = multi_head_attention(h2, encoder_output, encoder_output, src_mask,
                             params["self_attn"], h=h, residual=x)

    # Sublayer 3: feed-forward (linear -> ReLU -> linear), residual fused.
    B, S, D = x.shape
    h3 = layer_norm(x, ln[2]["alpha"], ln[2]["bias"], eps=eps)
    f1 = linear(h3.reshape(B * S, D), params["ffn"]["w1"], params["ffn"]["b1"],
                activation="relu")
    x = linear(f1, params["ffn"]["w2"], params["ffn"]["b2"],
               residual=x.reshape(B * S, D)).reshape(B, S, D)
    return x


# ---------------------------------------------------------------------------
# Parameter init (mirrors nn.Linear defaults; weights stored transposed)
# ---------------------------------------------------------------------------

def _init_linear(key, d_in, d_out, dtype):
    kw, kb = jax.random.split(key)
    bound = 1.0 / math.sqrt(d_in)
    w = jax.random.uniform(kw, (d_in, d_out), dtype, -bound, bound)
    b = jax.random.uniform(kb, (d_out,), dtype, -bound, bound)
    return w, b


def _init_mha(key, d_model, dtype):
    ks = jax.random.split(key, 4)
    p = {}
    for name, kk in zip(("q", "k", "v", "o"), ks):
        w, b = _init_linear(kk, d_model, d_model, dtype)
        p["w" + name] = w
        p["b" + name] = b
    return p


def init_params(key, d_model, d_ff, dtype=jnp.float32):
    k_self, k_cross, k_ff1, k_ff2 = jax.random.split(key, 4)
    w1, b1 = _init_linear(k_ff1, d_model, d_ff, dtype)
    w2, b2 = _init_linear(k_ff2, d_ff, d_model, dtype)
    return {
        "self_attn": _init_mha(k_self, d_model, dtype),
        "cross_attn": _init_mha(k_cross, d_model, dtype),  # unused (see note)
        "ffn": {"w1": w1, "b1": b1, "w2": w2, "b2": b2},
        "ln": [{"alpha": jnp.ones((1,), dtype), "bias": jnp.zeros((1,), dtype)}
               for _ in range(3)],
    }


# ---------------------------------------------------------------------------
# Pure-JAX reference for correctness checking
# ---------------------------------------------------------------------------

def _ref_layer_norm(x, alpha, beta, eps):
    mean = jnp.mean(x, axis=-1, keepdims=True)
    cent = x - mean
    var = jnp.sum(cent * cent, axis=-1, keepdims=True) / (x.shape[-1] - 1)
    return alpha * cent / (jnp.sqrt(var) + eps) + beta


def _ref_mha(q_in, k_in, v_in, mask, p, h):
    B, Sq, D = q_in.shape
    Sk = k_in.shape[1]
    dk = D // h
    q = (q_in @ p["wq"] + p["bq"]).reshape(B, Sq, h, dk).transpose(0, 2, 1, 3)
    k = (k_in @ p["wk"] + p["bk"]).reshape(B, Sk, h, dk).transpose(0, 2, 1, 3)
    v = (v_in @ p["wv"] + p["bv"]).reshape(B, Sk, h, dk).transpose(0, 2, 1, 3)
    s = jnp.einsum("bhqd,bhkd->bhqk", q, k) / math.sqrt(dk)
    s = jnp.where(mask == 0, -1e9, s)
    a = jax.nn.softmax(s, axis=-1)
    ctx = jnp.einsum("bhqk,bhkd->bhqd", a, v).transpose(0, 2, 1, 3).reshape(B, Sq, D)
    return ctx @ p["wo"] + p["bo"]


def _ref_decoder_block(x, enc, src_mask, tgt_mask, params, h, eps=1e-6):
    ln = params["ln"]
    h1 = _ref_layer_norm(x, ln[0]["alpha"], ln[0]["bias"], eps)
    x = x + _ref_mha(h1, h1, h1, tgt_mask, params["self_attn"], h)
    h2 = _ref_layer_norm(x, ln[1]["alpha"], ln[1]["bias"], eps)
    x = x + _ref_mha(h2, enc, enc, src_mask, params["self_attn"], h)
    h3 = _ref_layer_norm(x, ln[2]["alpha"], ln[2]["bias"], eps)
    f = jnp.maximum(h3 @ params["ffn"]["w1"] + params["ffn"]["b1"], 0.0)
    return x + f @ params["ffn"]["w2"] + params["ffn"]["b2"]


if __name__ == "__main__":
    batch, seq, enc_seq, d_model, h, d_ff = 2, 8, 8, 32, 4, 64

    key = jax.random.PRNGKey(0)
    kx, ke, kp = jax.random.split(key, 3)
    x = jax.random.normal(kx, (batch, seq, d_model), jnp.float32)
    enc = jax.random.normal(ke, (batch, enc_seq, d_model), jnp.float32)
    params = init_params(kp, d_model, d_ff)

    # Masks: 1 = keep, 0 = mask (reference fills masked scores with -1e9).
    tgt_mask = jnp.tril(jnp.ones((seq, seq), jnp.int32))[None, None]
    tgt_mask = jnp.broadcast_to(tgt_mask, (batch, 1, seq, seq))
    src_mask = jnp.ones((batch, 1, seq, enc_seq), jnp.int32)
    src_mask = src_mask.at[1, :, :, enc_seq - 2:].set(0)

    out = decoder_block(x, enc, src_mask, tgt_mask, params, h=h)
    jax.block_until_ready(out)

    ref = _ref_decoder_block(x, enc, src_mask, tgt_mask, params, h)
    assert out.shape == (batch, seq, d_model)
    err = float(jnp.max(jnp.abs(out - ref)))
    assert jnp.allclose(out, ref, atol=2e-3, rtol=2e-3), err

    print("KERNEL_OK")
</pallas_src>

<mosaic_0001>
module attributes {stable_mosaic.version = 11 : i64} {
  func.func @_layernorm_kernel(%arg0: i32, %arg1: memref<16x32xf32, #tpu.memory_space<vmem>>, %arg2: memref<1x1xf32, #tpu.memory_space<vmem>>, %arg3: memref<1x1xf32, #tpu.memory_space<vmem>>, %arg4: memref<16x32xf32, #tpu.memory_space<vmem>>) attributes {dimension_semantics = [#tpu.dimension_semantics<parallel>], iteration_bounds = array<i64: 1>, scalar_prefetch = 0 : i64, scratch_operands = 0 : i64, tpu.core_type = #tpu.core_type<tc>, window_params = [{transform_indices = @transform_0, window_bounds = array<i64: 16, 32>}, {pipeline_mode = #tpu.pipeline_mode<synchronous>, transform_indices = @transform_1, window_bounds = array<i64: 1, 1>}, {pipeline_mode = #tpu.pipeline_mode<synchronous>, transform_indices = @transform_2, window_bounds = array<i64: 1, 1>}, {transform_indices = @transform_3, window_bounds = array<i64: 16, 32>}]} {
    %c0 = arith.constant 0 : index
    %c0_0 = arith.constant 0 : index
    %0 = vector.load %arg1[%c0, %c0_0] : memref<16x32xf32, #tpu.memory_space<vmem>>, vector<16x32xf32>
    %cst = arith.constant dense<0.000000e+00> : vector<16xf32>
    %1 = vector.multi_reduction <add>, %0, %cst [1] : vector<16x32xf32> to vector<16xf32>
    %2 = vector.shape_cast %1 : vector<16xf32> to vector<16x1xf32>
    %cst_1 = arith.constant 3.200000e+01 : f32
    %3 = vector.broadcast %cst_1 : f32 to vector<16x1xf32>
    %4 = arith.divf %2, %3 : vector<16x1xf32>
    %5 = vector.broadcast %4 : vector<16x1xf32> to vector<16x32xf32>
    %6 = arith.subf %0, %5 : vector<16x32xf32>
    %7 = arith.mulf %6, %6 : vector<16x32xf32>
    %cst_2 = arith.constant dense<0.000000e+00> : vector<16xf32>
    %8 = vector.multi_reduction <add>, %7, %cst_2 [1] : vector<16x32xf32> to vector<16xf32>
    %9 = vector.shape_cast %8 : vector<16xf32> to vector<16x1xf32>
    %cst_3 = arith.constant 3.100000e+01 : f32
    %10 = vector.broadcast %cst_3 : f32 to vector<16x1xf32>
    %11 = arith.divf %9, %10 : vector<16x1xf32>
    %12 = math.sqrt %11 : vector<16x1xf32>
    %c0_4 = arith.constant 0 : index
    %c0_5 = arith.constant 0 : index
    %13 = vector.load %arg2[%c0_4, %c0_5] : memref<1x1xf32, #tpu.memory_space<vmem>>, vector<1x1xf32>
    %14 = vector.broadcast %13 : vector<1x1xf32> to vector<16x32xf32>
    %15 = arith.mulf %14, %6 : vector<16x32xf32>
    %cst_6 = arith.constant 9.99999997E-7 : f32
    %16 = vector.broadcast %cst_6 : f32 to vector<16x1xf32>
    %17 = arith.addf %12, %16 : vector<16x1xf32>
    %18 = vector.broadcast %17 : vector<16x1xf32> to vector<16x32xf32>
    %19 = arith.divf %15, %18 : vector<16x32xf32>
    %c0_7 = arith.constant 0 : index
    %c0_8 = arith.constant 0 : index
    %20 = vector.load %arg3[%c0_7, %c0_8] : memref<1x1xf32, #tpu.memory_space<vmem>>, vector<1x1xf32>
    %21 = vector.broadcast %20 : vector<1x1xf32> to vector<16x32xf32>
    %22 = arith.addf %19, %21 : vector<16x32xf32>
    %c0_9 = arith.constant 0 : index
    %c0_10 = arith.constant 0 : index
    %23 = vector.load %arg4[%c0_9, %c0_10] : memref<16x32xf32, #tpu.memory_space<vmem>>, vector<16x32xf32>
    tpu.vector_store %arg4[%c0_9, %c0_10], %22 {strides = array<i32>} : memref<16x32xf32, #tpu.memory_space<vmem>>, vector<16x32xf32>,
    return
  }
  func.func @transform_0(%arg0: i32) -> (i32, i32) {
    %c0_i32 = arith.constant 0 : i32
    %c0_i32_0 = arith.constant 0 : i32
    return %arg0, %c0_i32 : i32, i32
  }
  func.func @transform_1(%arg0: i32) -> (i32, i32) {
    %c0_i32 = arith.constant 0 : i32
    %c0_i32_0 = arith.constant 0 : i32
    %c0_i32_1 = arith.constant 0 : i32
    return %c0_i32, %c0_i32_0 : i32, i32
  }
  func.func @transform_2(%arg0: i32) -> (i32, i32) {
    %c0_i32 = arith.constant 0 : i32
    %c0_i32_0 = arith.constant 0 : i32
    %c0_i32_1 = arith.constant 0 : i32
    return %c0_i32, %c0_i32_0 : i32, i32
  }
  func.func @transform_3(%arg0: i32) -> (i32, i32) {
    %c0_i32 = arith.constant 0 : i32
    %c0_i32_0 = arith.constant 0 : i32
    return %arg0, %c0_i32 : i32, i32
  }
}

</mosaic_0001>

<bundles_post_ra>
// kernel: tpu_custom_call.1
= control target key start
LH: loop header
LB: loop body
LE: loop exit
PB: predicated region body
PF: predicated region fallthrough
CT: control target
= control target key end

     0   :  { %s231_s0 = inlined_call_operand.hbm [shape: f32[16,32], index: 0, kind: input, shape index: {}]   ;;  %s232_s1 = inlined_call_operand.<no memory space> [shape: f32[1,1], index: 1, kind: input, shape index: {}]   ;;  %s233_s3 = inlined_call_operand.hbm [shape: f32[16,32], index: 3, kind: output, shape index: {}]   ;;  %s234_s2 = inlined_call_operand.<no memory space> [shape: f32[1,1], index: 2, kind: input, shape index: {}]  }
   0x1   :  { %v8_v0 = vstv %s232_s1  ;;  %v10_v1 = vstv %s234_s2 }
   0x2   :  { %9 = vst [vmem:[#allocation2] sm:$0x1] %v8_v0  ;;  %11 = vst [vmem:[#allocation3] sm:$0x1] %v10_v1 }
   0x3   :  { %12 = vsyncpa [#allocation5], 0 }
   0x4   :  { %13 = vsyncpa [#allocation6], 0  ;;  %s182_s16 = smov [#allocation4]  }
   0x5   :  { %s19_s17 = sshll.u32 %s182_s16, 4  ;;  %s20_s17 = int_to_ptr.vmem [resolvable:$true] %s19_s17 }
   0x6   :  { %s146_s18 = scalar_lea.vmem %s20_s17, 256  ;;  %p151_p1 = scmp.lt.s32.totalorder %s20_s17, %s20_s17 }
   0x7   :  { %p147_p0 = scmp.ne.s32.totalorder %s20_s17, %s146_s18  ;;  %p152_p2 = scmp.lt.s32.totalorder %s146_s18, %s146_s18 }
   0x9   :  { %p153_p3 = por %p152_p2, %p151_p1 }
   0xb   :  { %p154_p4 = pnand %p153_p3, %p147_p0 }
   0xd   :  { %157 = shalt.err (!%p154_p4)
}
   0xe   :  { %s183_s19 = smov 128   ;;  %s184_s1 = smov 8  }
   0xf   :  { %25 = dma.hbm_to_vmem [thread:$0]  %s231_s0, 256, %s20_s17, [#allocation5], %s183_s19, %s183_s19, %s184_s1  }
  0x10   :  { %178 = dma.done.wait [#allocation5], 256  }
  0x11   :  { %179 = vsyncadd [#allocation5], 4294967040  ;;  %v185_v2 = vmov 0   ;;  %vm35_vm0 = vcmask 261120   ;;  %v33_v3 = vld [vmem:[#allocation4] sm:$0xff]  ;;  %v34_v4 = vld [vmem:[#allocation4 + $0x8] sm:$0xff] }
  0x12   :  { %128 = vset.pattern.permute.xlu0 %v185_v2  ;;  %129 = vset.pattern.permute.xlu1 %v185_v2  ;;  %v36_v5 = vsel %vm35_vm0, %v33_v3, 0.0  ;;  %v39_v6 = vsel %vm35_vm0, %v34_v4, 0.0  ;;  %v121_v7 = vld [vmem:[#allocation2] ss:$0 sm:$0xff]  ;;  %v122_v18 = vld [vmem:[#allocation3] ss:$0 sm:$0xff] }
  0x13   :  { %37 = vadd.xlane.f32.xlu0 %v36_v5  ;;  %s186_s0 = smov [#allocation7]  }
  0x14   :  { %s109_s21 = sshll.u32 %s186_s0, 4  ;;  %s110_s21 = int_to_ptr.vmem [resolvable:$true] %s109_s21 }
  0x15   :  { %s158_s22 = scalar_lea.vmem %s110_s21, 256  ;;  %p163_p6 = scmp.lt.s32.totalorder %s110_s21, %s110_s21 }
  0x16   :  { %p159_p5 = scmp.ne.s32.totalorder %s110_s21, %s158_s22  ;;  %p164_p7 = scmp.lt.s32.totalorder %s158_s22, %s158_s22 }
  0x17   :  { %40 = vadd.xlane.f32.xlu0 %v39_v6 }
  0x18   :  { %p165_p8 = por %p164_p7, %p163_p6 }
  0x1a   :  { %p166_p9 = pnand %p165_p8, %p159_p5 }
  0x2d   :  { %79 = vperm.xlu0 %128, %v121_v7  }
  0x9c   :  { %v38_v8 = vpop.xlane.xlu0 %37 }
  0x9d   :  { %v43_v9 = vmul.f32 0.03125, %v38_v8 }
  0x9f   :  { %v45_v10 = vsub.f32 %v33_v3, %v43_v9 }
  0xa0   :  { %v41_v11 = vpop.xlane.xlu0 %40 }
  0xa1   :  { %v44_v12 = vmul.f32 0.03125, %v41_v11  ;;  %v47_v13 = vmul.f32 %v45_v10, %v45_v10 }
  0xa3   :  { %v46_v14 = vsub.f32 %v34_v4, %v44_v12  ;;  %v49_v15 = vsel %vm35_vm0, %v47_v13, 0.0 }
  0xa4   :  { %50 = vadd.xlane.f32.xlu1 %v49_v15 }
  0xa5   :  { %v48_v16 = vmul.f32 %v46_v14, %v46_v14 }
  0xa7   :  { %v52_v17 = vsel %vm35_vm0, %v48_v16, 0.0 }
  0xa8   :  { %53 = vadd.xlane.f32.xlu1 %v52_v17  ;;  %v80_v35 = vpop.permute.xlu0 %79 }
  0xa9   :  { %v82_v36 = vmul.f32 %v80_v35, %v45_v10  ;;  %v83_v40 = vmul.f32 %v80_v35, %v46_v14 }
  0xb9   :  { %97 = vperm.xlu1 %129, %v122_v18  }
 0x12d   :  { %v51_v19 = vpop.xlane.xlu1 %50 }
 0x12e   :  { %v56_v20 = vmul.f32 0.032258064, %v51_v19 }
 0x130   :  { %130 = vrsqrt.f32 %v56_v20  ;;  %vm60_vm1 = vcmp.eq.f32.partialorder %v56_v20, inf  ;;  %v63_v25 = vand.u32 2147483648, %v56_v20  ;;  %vm62_vm2 = vcmp.eq.f32.partialorder %v56_v20, 0.0 }
 0x131   :  { %v54_v21 = vpop.xlane.xlu1 %53 }
 0x132   :  { %v57_v22 = vmul.f32 0.032258064, %v54_v21 }
 0x134   :  { %132 = vrsqrt.f32 %v57_v22  ;;  %vm67_vm3 = vcmp.eq.f32.partialorder %v57_v22, inf  ;;  %v70_v31 = vand.u32 2147483648, %v57_v22  ;;  %vm69_vm4 = vcmp.eq.f32.partialorder %v57_v22, 0.0 }
 0x135   :  { %v98_v38 = vpop.permute.xlu1 %97 }
 0x13d   :  { %v131_v23 = vpop.eup %130 }
 0x13e   :  { %v59_v24 = vmul.f32 %v131_v23, %v56_v20 }
 0x140   :  { %v61_v26 = vsel %vm60_vm1, %v56_v20, %v59_v24 }
 0x141   :  { %v133_v27 = vpop.eup %132  ;;  %v64_v28 = vsel %vm62_vm2, %v63_v25, %v61_v26 }
 0x142   :  { %v66_v29 = vmul.f32 %v133_v27, %v57_v22  ;;  %v84_v30 = vadd.f32 1e-06, %v64_v28 }
 0x144   :  { %v68_v32 = vsel %vm67_vm3, %v57_v22, %v66_v29  ;;  %134 = vrcp.f32 %v84_v30 }
 0x145   :  { %v71_v33 = vsel %vm69_vm4, %v70_v31, %v68_v32 }
 0x146   :  { %v85_v34 = vadd.f32 1e-06, %v71_v33 }
 0x148   :  { %136 = vrcp.f32 %v85_v34 }
 0x151   :  { %v135_v37 = vpop.eup %134 }
 0x152   :  { %v87_v39 = vmul.f32 %v135_v37, %v82_v36 }
 0x154   :  { %v100_v41 = vadd.f32 %v98_v38, %v87_v39 }
 0x155   :  { %v137_v42 = vpop.eup %136 }
 0x156   :  { %v89_v43 = vmul.f32 %v137_v42, %v83_v40  ;;  %102 = vst.msk [vmem:[#allocation7] sm:$0xff] %vm35_vm0, %v100_v41 }
 0x158   :  { %v101_v44 = vadd.f32 %v98_v38, %v89_v43 }
 0x15a   :  { %103 = vst.msk [vmem:[#allocation7 + $0x8] sm:$0xff] %vm35_vm0, %v101_v44 }
 0x15b   :  { %169 = shalt.err (!%p166_p9)
}
 0x15c   :  { %115 = dma.vmem_to_hbm [thread:$0]  %s110_s21, 256, %s233_s3, [#allocation6], %s183_s19, %s183_s19, %s184_s1  }
 0x15d   :  { %180 = dma.done.wait [#allocation6], 256  }
 0x15e   :  { %181 = vsyncadd [#allocation6], 4294967040 }
 0x15f   :  { %119 = vsyncpa [#allocation5], 1 }
 0x160   :  { %120 = vsyncpa [#allocation6], 1 }

</bundles_post_ra>
